<compile_context>
chip_gen: v6e
topology: v6e:2x2x1
jax: 0.10.0
libtpu: 0.0.40
codegen_flags: <defaults>
</compile_context>

<pallas_src>
import jax
import jax.numpy as jnp
from jax.experimental import pallas as pl
from jax.experimental.pallas import tpu as pltpu


def _round_up(a: int, b: int) -> int:
    return (a + b - 1) // b * b


def _sublane(dtype) -> int:
    # sub-32-bit dtypes pack 2 rows per sublane -> block sublane dim must be x16
    return 16 if jnp.dtype(dtype).itemsize == 2 else 8


def squash_linear_kernel(t_ref, x_ref, w_ref, aux_ref, o_ref):
    # t_ref  : (1,)             scalar time, SMEM
    # x_ref  : (tm, k_pad)      input tile (K collapsed: whole reduction)
    # w_ref  : (k_pad, n_pad)   full padded weight, resident in VMEM
    # aux_ref: (8, n_pad)       row 0 = bias, row 1 = hyper weight, row 2 = hyper bias
    # o_ref  : (tm, n_pad)      output tile (lane-dense, full vst)
    acc = jnp.dot(x_ref[...], w_ref[...], preferred_element_type=jnp.float32)

    t = t_ref[0].astype(jnp.float32)
    b = aux_ref[0:1, :].astype(jnp.float32)     # (1, n_pad)
    wh = aux_ref[1:2, :].astype(jnp.float32)    # (1, n_pad)
    bh = aux_ref[2:3, :].astype(jnp.float32)    # (1, n_pad)

    gate = jax.nn.sigmoid(t * wh + bh)          # (1, n_pad), broadcast over rows
    o_ref[...] = ((acc + b) * gate).astype(o_ref.dtype)


def prepare_params(w_layer, b_layer, w_hyper, b_hyper, *, compute_dtype=jnp.float32):
    """One-time parameter layout prep (call once, reuse across forward calls).

    - transposes torch-layout layer weight (Dout, Din) -> (Din, Dout)
    - pads Din/Dout up to multiples of 128 (lane-dense, MXU-aligned)
    - packs bias / hyper weight / hyper bias into one (8, Dout_pad) aux array
    - casts weight/aux to `compute_dtype` (use jnp.bfloat16 for MXU peak)
    """
    dim_out, dim_in = w_layer.shape
    n_pad = _round_up(dim_out, 128)
    k_pad = _round_up(dim_in, 128)

    w_t = (
        jnp.zeros((k_pad, n_pad), compute_dtype)
        .at[:dim_in, :dim_out]
        .set(w_layer.T.astype(compute_dtype))
    )
    # aux rows: 0 = layer bias, 1 = hyper weight (torch (Dout,1) -> row), 2 = hyper bias.
    # Padded lanes stay zero => acc=0, bias=0, gate=sigmoid(0)=0.5, out=0 (sliced off).
    aux = jnp.zeros((8, n_pad), compute_dtype)
    aux = aux.at[0, :dim_out].set(b_layer.astype(compute_dtype))
    aux = aux.at[1, :dim_out].set(w_hyper.reshape(-1).astype(compute_dtype))
    aux = aux.at[2, :dim_out].set(b_hyper.astype(compute_dtype))

    return dict(
        w=w_t, aux=aux,
        dim_in=dim_in, dim_out=dim_out,
        n_pad=n_pad, k_pad=k_pad,
        compute_dtype=jnp.dtype(compute_dtype),
    )


def pad_input(x, params, tm):
    """Pad x to (round_up(B, tm), k_pad) in the compute dtype.

    For the real ODE loop, keep the state pre-padded OUTSIDE the loop (or fuse
    the pad into the producing layer) so this copy isn't paid per forward call.
    """
    B, din = x.shape
    k_pad = params["k_pad"]
    m_pad = _round_up(B, tm)
    cdt = params["compute_dtype"]
    if (m_pad, k_pad) == (B, din) and x.dtype == cdt:
        return x
    return jnp.zeros((m_pad, k_pad), cdt).at[:B, :din].set(x.astype(cdt))


def squash_linear(t, x, params, *, tm=512, out_dtype=None):
    """t: scalar; x: (B, Din); params: output of prepare_params()."""
    B, din = x.shape
    assert din == params["dim_in"]
    n_pad, k_pad = params["n_pad"], params["k_pad"]
    dim_out = params["dim_out"]
    cdt = params["compute_dtype"]
    out_dtype = jnp.dtype(out_dtype or x.dtype)

    sub = _sublane(cdt)
    tm = min(tm, _round_up(B, sub))
    # v7x has 2 TensorCores fed by 'parallel' grid axes: make sure there are
    # >= 2 M blocks whenever the batch allows it (free on single-TC chips).
    if B > sub and -(-B // tm) < 2:
        tm = _round_up(-(-B // 2), sub)
    m_pad = _round_up(B, tm)

    x_p = pad_input(x, params, tm)
    t_arr = jnp.asarray(t, jnp.float32).reshape(1)

    grid = (m_pad // tm,)

    # VMEM budget from the actual buffers (double-buffered x/out/aux +
    # conservatively double-buffered resident W) + headroom; valid on v7x's
    # 64 MiB VMEM as well as v6e/v5e's 128 MiB.
    c_it = cdt.itemsize
    o_it = out_dtype.itemsize
    vmem_req = (
        2 * (tm * k_pad * c_it + tm * n_pad * o_it + 8 * n_pad * c_it)
        + 2 * k_pad * n_pad * c_it
    )
    assert vmem_req <= 60 * 1024 * 1024, (
        "padded weight/tiles exceed VMEM budget; re-enable N/K blocking"
    )
    vmem_limit = min(vmem_req + (2 << 20), 64 * 1024 * 1024)

    cost = pl.CostEstimate(
        flops=2 * m_pad * k_pad * n_pad + 3 * m_pad * n_pad,
        transcendentals=len(grid) and grid[0] * n_pad,
        bytes_accessed=(m_pad * k_pad + k_pad * n_pad + 8 * n_pad) * c_it
        + m_pad * n_pad * o_it,
    )

    out = pl.pallas_call(
        squash_linear_kernel,
        out_shape=jax.ShapeDtypeStruct((m_pad, n_pad), out_dtype),
        grid=grid,
        in_specs=[
            pl.BlockSpec(memory_space=pltpu.MemorySpace.SMEM),       # t (scalar path)
            pl.BlockSpec((tm, k_pad), lambda i: (i, 0)),             # x M-tile
            pl.BlockSpec((k_pad, n_pad), lambda i: (0, 0)),          # W^T, resident
            pl.BlockSpec((8, n_pad), lambda i: (0, 0)),              # packed aux rows
        ],
        out_specs=pl.BlockSpec((tm, n_pad), lambda i: (i, 0)),
        compiler_params=pltpu.CompilerParams(
            dimension_semantics=("parallel",),
            vmem_limit_bytes=int(vmem_limit),
        ),
        cost_estimate=cost,
    )(t_arr, x_p, params["w"], params["aux"])

    return out[:B, :dim_out]


def reference(t, x, w_layer, b_layer, w_hyper, b_hyper):
    y = x @ w_layer.T + b_layer
    g = jax.nn.sigmoid(jnp.asarray(t).reshape(-1, 1) @ w_hyper.T + b_hyper)
    return y * g


if __name__ == "__main__":
    key = jax.random.PRNGKey(0)
    k1, k2, k3, k4, k5 = jax.random.split(key, 5)

    # Small shapes consistent with the module; dim_in=192 / dim_out=96 pad to
    # 256 / 128 lanes, batch=16 gives two M tiles (exercises the M grid).
    batch, dim_in, dim_out = 16, 192, 96

    bound_l = 1.0 / jnp.sqrt(dim_in)
    w_layer = jax.random.uniform(k1, (dim_out, dim_in), jnp.float32, -bound_l, bound_l)
    b_layer = jax.random.uniform(k2, (dim_out,), jnp.float32, -bound_l, bound_l)
    w_hyper = jax.random.uniform(k3, (dim_out, 1), jnp.float32, -1.0, 1.0)
    b_hyper = jax.random.uniform(k4, (dim_out,), jnp.float32, -1.0, 1.0)

    x = jax.random.normal(k5, (batch, dim_in), jnp.float32)
    t = jnp.float32(0.37)

    ref = reference(t, x, w_layer, b_layer, w_hyper, b_hyper)

    # f32 path (tight tolerance)
    params_f32 = prepare_params(w_layer, b_layer, w_hyper, b_hyper,
                                compute_dtype=jnp.float32)
    out = jax.block_until_ready(squash_linear(t, x, params_f32))
    assert out.shape == (batch, dim_out)
    assert jnp.allclose(out, ref, atol=1e-5, rtol=1e-5)

    # bf16 compute path (MXU-native on v5e/v6e/v7x; f32 accumulation in-kernel)
    params_bf16 = prepare_params(w_layer, b_layer, w_hyper, b_hyper,
                                 compute_dtype=jnp.bfloat16)
    out_bf16 = jax.block_until_ready(
        squash_linear(t, x, params_bf16, out_dtype=jnp.float32)
    )
    assert out_bf16.shape == (batch, dim_out)
    assert jnp.allclose(out_bf16, ref, atol=1e-1, rtol=1e-1)

    print("KERNEL_OK")
</pallas_src>

<mosaic_0001>
module attributes {stable_mosaic.version = 11 : i64} {
  func.func @squash_linear_kernel(%arg0: i32, %arg1: memref<1xf32, #tpu.memory_space<smem>>, %arg2: memref<8x256xf32, #tpu.memory_space<vmem>>, %arg3: memref<256x128xf32, #tpu.memory_space<vmem>>, %arg4: memref<8x128xf32, #tpu.memory_space<vmem>>, %arg5: memref<8x128xf32, #tpu.memory_space<vmem>>) attributes {dimension_semantics = [#tpu.dimension_semantics<parallel>], iteration_bounds = array<i64: 2>, scalar_prefetch = 0 : i64, scratch_operands = 0 : i64, tpu.core_type = #tpu.core_type<tc>, window_params = [{transform_indices = @transform_0, window_bounds = array<i64: 1>}, {transform_indices = @transform_1, window_bounds = array<i64: 8, 256>}, {pipeline_mode = #tpu.pipeline_mode<synchronous>, transform_indices = @transform_2, window_bounds = array<i64: 256, 128>}, {pipeline_mode = #tpu.pipeline_mode<synchronous>, transform_indices = @transform_3, window_bounds = array<i64: 8, 128>}, {transform_indices = @transform_4, window_bounds = array<i64: 8, 128>}]} {
    %c0 = arith.constant 0 : index
    %c0_0 = arith.constant 0 : index
    %0 = vector.load %arg2[%c0, %c0_0] : memref<8x256xf32, #tpu.memory_space<vmem>>, vector<8x256xf32>
    %c0_1 = arith.constant 0 : index
    %c0_2 = arith.constant 0 : index
    %1 = vector.load %arg3[%c0_1, %c0_2] : memref<256x128xf32, #tpu.memory_space<vmem>>, vector<256x128xf32>
    %cst = arith.constant dense<0.000000e+00> : vector<8x128xf32>
    %2 = tpu.matmul %0, %1, %cst {dimension_numbers = #tpu.dot_dimension_numbers<[1], [0], [0], [1], [0, 0, 1, 1], [], []>} : vector<8x256xf32>, vector<256x128xf32>, vector<8x128xf32> -> vector<8x128xf32>
    %c0_3 = arith.constant 0 : index
    %3 = memref.load %arg1[%c0_3] : memref<1xf32, #tpu.memory_space<smem>>
    %c0_4 = arith.constant 0 : index
    %c0_5 = arith.constant 0 : index
    %4 = vector.load %arg4[%c0_4, %c0_5] : memref<8x128xf32, #tpu.memory_space<vmem>>, vector<1x128xf32>
    %c1 = arith.constant 1 : index
    %c0_6 = arith.constant 0 : index
    %5 = vector.load %arg4[%c1, %c0_6] : memref<8x128xf32, #tpu.memory_space<vmem>>, vector<1x128xf32>
    %c2 = arith.constant 2 : index
    %c0_7 = arith.constant 0 : index
    %6 = vector.load %arg4[%c2, %c0_7] : memref<8x128xf32, #tpu.memory_space<vmem>>, vector<1x128xf32>
    %7 = vector.broadcast %3 : f32 to vector<1x128xf32>
    %8 = arith.mulf %7, %5 : vector<1x128xf32>
    %9 = arith.addf %8, %6 : vector<1x128xf32>
    %10 = arith.negf %9 : vector<1x128xf32>
    %11 = math.exp %10 : vector<1x128xf32>
    %cst_8 = arith.constant 1.000000e+00 : f32
    %12 = vector.broadcast %cst_8 : f32 to vector<1x128xf32>
    %13 = arith.addf %12, %11 : vector<1x128xf32>
    %14 = arith.divf %12, %13 : vector<1x128xf32>
    %15 = vector.broadcast %4 : vector<1x128xf32> to vector<8x128xf32>
    %16 = arith.addf %2, %15 : vector<8x128xf32>
    %17 = vector.broadcast %14 : vector<1x128xf32> to vector<8x128xf32>
    %18 = arith.mulf %16, %17 : vector<8x128xf32>
    %c0_9 = arith.constant 0 : index
    %c0_10 = arith.constant 0 : index
    %19 = vector.load %arg5[%c0_9, %c0_10] : memref<8x128xf32, #tpu.memory_space<vmem>>, vector<8x128xf32>
    tpu.vector_store %arg5[%c0_9, %c0_10], %18 {strides = array<i32>} : memref<8x128xf32, #tpu.memory_space<vmem>>, vector<8x128xf32>,
    return
  }
  func.func @transform_0(%arg0: i32) -> i32 {
    %c0_i32 = arith.constant 0 : i32
    %c0_i32_0 = arith.constant 0 : i32
    return %c0_i32 : i32
  }
  func.func @transform_1(%arg0: i32) -> (i32, i32) {
    %c0_i32 = arith.constant 0 : i32
    %c0_i32_0 = arith.constant 0 : i32
    return %arg0, %c0_i32 : i32, i32
  }
  func.func @transform_2(%arg0: i32) -> (i32, i32) {
    %c0_i32 = arith.constant 0 : i32
    %c0_i32_0 = arith.constant 0 : i32
    %c0_i32_1 = arith.constant 0 : i32
    return %c0_i32, %c0_i32_0 : i32, i32
  }
  func.func @transform_3(%arg0: i32) -> (i32, i32) {
    %c0_i32 = arith.constant 0 : i32
    %c0_i32_0 = arith.constant 0 : i32
    %c0_i32_1 = arith.constant 0 : i32
    return %c0_i32, %c0_i32_0 : i32, i32
  }
  func.func @transform_4(%arg0: i32) -> (i32, i32) {
    %c0_i32 = arith.constant 0 : i32
    %c0_i32_0 = arith.constant 0 : i32
    return %arg0, %c0_i32 : i32, i32
  }
}

</mosaic_0001>

<bundles_post_ra>
// kernel: tpu_custom_call.1
= control target key start
LH: loop header
LB: loop body
LE: loop exit
PB: predicated region body
PF: predicated region fallthrough
CT: control target
= control target key end

     0   :  { %s954_s0 = inlined_call_operand.<no memory space> [shape: f32[1], index: 0, kind: input, shape index: {}]   ;;  %s955_s1 = inlined_call_operand.hbm [shape: f32[16,256], index: 1, kind: input, shape index: {}]   ;;  %s956_s2 = inlined_call_operand.hbm [shape: f32[256,128], index: 2, kind: input, shape index: {}]   ;;  %s957_s3 = inlined_call_operand.hbm [shape: f32[8,128], index: 3, kind: input, shape index: {}]   ;;  %s958_s4 = inlined_call_operand.hbm [shape: f32[16,128], index: 4, kind: output, shape index: {}]  }
   0x1   :  { %9 = sst [smem:[#allocation2]] %s954_s0 }
   0x2   :  { %10 = vsyncpa [#allocation4], 0 }
   0x3   :  { %12 = vsyncpa [#allocation4 + $0x1], 0 }
   0x4   :  { %13 = vsyncpa [#allocation7], 0 }
   0x5   :  { %14 = vsyncpa [#allocation5], 0 }
   0x6   :  { %16 = vsyncpa [#allocation5 + $0x1], 0  ;;  %s784_s17 = smov 0   ;;  %s786_s18 = smov 0  }
   0x7   :  { %s788_s19 = smov 0   ;;  %s790_s20 = smov 0  }
   0x8 LB: > { %s805_s0 = sadd.s32 4294967295, %s748_s20   ;;  %s472_s21 = sadd.s32 4294967294, %s748_s20   ;;  %s748_s20 = sphi %s790_s20, %s980_s20   ;;  %s744_s19 = sphi %s788_s19, %s979_s19   ;;  %s740_s18 = sphi %s786_s18, %s978_s18   ;;  %s736_s17 = sphi %s784_s17, %s977_s17  }
   0x9   : > { %p63_p0 = scmp.ne.s32.totalorder %s740_s18, %s736_s17  ;;  %p959_p1 = scmp.eq.s32.totalorder %s805_s0, 0 }
   0xa   : > { %p135_p3 = scmp.eq.s32.totalorder %s472_s21, 1  ;;  %p473_p5 = scmp.ge.s32.totalorder %s748_s20, 1 }
   0xb   : > { %p814_p4 = por %p959_p1, %p63_p0  ;;  %p142_p7 = scmp.lt.s32.totalorder %s748_s20, 3 }
   0xc   : > { %p819_p6 = por %p135_p3, %p63_p0  ;;  %s750_s25 = smov [#allocation6]  }
   0xd   : > { %s963_s22 = scalar_select %p814_p4, 1, 0 }
   0xe   : > { %s964_s23 = scalar_select %p819_p6, 1, 0 }
   0xf   : > { %p824_p8 = pnand %p473_p5, %p142_p7  ;;  %s157_s26 = sshll.u32 %s750_s25, 4  ;;  %s158_s26 = int_to_ptr.vmem [resolvable:$true] %s157_s26 }
  0x10   : > { %s751_s28 = smov [#allocation8]   ;;  %s611_s30 = scalar_lea.vmem %s158_s26, 4096 }
  0x11   : > { %s965_s24 = scalar_select %p824_p8, 1, 0 }
  0x12   : > { %p539_p9 = pneg %p824_p8  ;;  %s171_s29 = sshll.u32 %s751_s28, 4  ;;  %s172_s29 = int_to_ptr.vmem [resolvable:$true] %s171_s29 }
  0x13   : > { %p612_p13 = scmp.ne.s32.totalorder %s158_s26, %s611_s30  ;;  %p619_p5 = scmp.lt.s32.totalorder %s158_s26, %s158_s26 }
  0x14   : > { %p833_p11 = pnand %p539_p9, %p959_p1  ;;  %p620_p7 = scmp.lt.s32.totalorder %s611_s30, %s611_s30 }
  0x16   : > { %p602_p12 = pneg %p833_p11  ;;  %p621_p10 = por %p620_p7, %p619_p5 }
  0x18   : > { %p614_p0 = pnand %p612_p13, %p602_p12 }
  0x1a   : > { %p615_p3 = pneg %p614_p0 }
  0x1c   : > { %p622_p9 = pnand %p621_p10, %p615_p3 }
  0x1e   : > { %625 = shalt.err (!%p622_p9)
}
  0x1f   : > { %s752_s5 = smov 128   ;;  %s753_s6 = smov 8  }
  0x20   : > { %542 = dma.hbm_to_vmem [thread:$0]  (!%p833_p11), %s956_s2, 4096, %s158_s26, [#allocation7], %s752_s5, %s752_s5, %s753_s6  }
  0x21   : > { %s637_s9 = scalar_lea.vmem %s172_s29, 128  ;;  %p645_p2 = scmp.lt.s32.totalorder %s172_s29, %s172_s29 }
  0x22   : > { %p638_p1 = scmp.ne.s32.totalorder %s172_s29, %s637_s9  ;;  %p646_p6 = scmp.lt.s32.totalorder %s637_s9, %s637_s9 }
  0x24   : > { %p640_p13 = pnand %p638_p1, %p602_p12  ;;  %p647_p5 = por %p646_p6, %p645_p2 }
  0x26   : > { %p641_p0 = pneg %p640_p13 }
  0x28   : > { %p648_p10 = pnand %p647_p5, %p641_p0 }
  0x2a   : > { %651 = shalt.err (!%p648_p10)
}
  0x2b   : > { %545 = dma.hbm_to_vmem [thread:$0]  (!%p833_p11), %s957_s3, 128, %s172_s29, [#allocation7]  }
  0x2c   : > { %s856_s12 = sadd.s32 1, %s748_s20   ;;  %s50_s13 = sadd.s32 1, %s744_s19 }
  0x2d   : > { %s47_s14 = ssub.s32 %s748_s20, %s856_s12  ;;  %p57_p1 = scmp.ne.s32.totalorder %s744_s19, %s740_s18 }
  0x2e   : > { %p48_p2 = scmp.eq.s32.totalorder %s47_s14, 0  ;;  %p58_p6 = scmp.eq.s32.totalorder %s748_s20, 0 }
  0x2f   : > { %p967_p12 = scmp.eq.s32.totalorder %s805_s0, 1  ;;  %p556_p7 = scmp.lt.s32.totalorder %s748_s20, 2 }
  0x30   : > { %s872_s16 = scalar_select %p48_p2, %s744_s19, %s50_s13  }
  0x31   : > { %p866_p3 = por %p967_p12, %p57_p1  ;;  %p59_p9 = por %p58_p6, %p57_p1 }
  0x32   : > { %s182_s21 = sand.u32 1, %s744_s19   ;;  %s491_s26 = sshll.u32 %s748_s20, 8 }
  0x33   : > { %s968_s15 = scalar_select %p866_p3, 1, 0 }
  0x34   : > { %s477_s25 = sshll.u32 %s182_s21, 4  ;;  %s879_s29 = scalar_lea.hbm %s955_s1, %s491_s26 }
  0x35   : > { %s186_s30 = scalar_lea.vmem [#allocation3], %s477_s25  ;;  %p881_p11 = pnand %p556_p7, %p59_p9 }
  0x36   : > { %s194_s5 = sshll.u32 %s186_s30, 4  ;;  %s183_s7 = scalar_lea.sflag [#allocation4], %s182_s21  ;;  %s195_s5 = int_to_ptr.vmem [resolvable:$true] %s194_s5 }
  0x37   : > { %s652_s8 = scalar_lea.hbm %s879_s29, 256  ;;  %p654_p0 = pneg %p881_p11 }
  0x38   : > { %p653_p13 = scmp.ne.s32.totalorder %s879_s29, %s652_s8  ;;  %s657_s11 = scalar_lea.hbm %s955_s1, 512 }
  0x39   : > { %p658_p1 = scmp.lt.s32.totalorder %s879_s29, %s955_s1  ;;  %p659_p2 = scmp.lt.s32.totalorder %s657_s11, %s652_s8 }
  0x3a   : > { %p655_p5 = pnand %p654_p0, %p653_p13 }
  0x3b   : > { %p660_p6 = por %p659_p2, %p658_p1 }
  0x3c   : > { %p656_p10 = pneg %p655_p5 }
  0x3e   : > { %p661_p12 = pnand %p660_p6, %p656_p10 }
  0x40   : > { %664 = shalt.err (!%p661_p12)
}
  0x41   : > { %s665_s25 = scalar_lea.vmem %s195_s5, 256  ;;  %s754_s21 = smov [#allocation3]  }
  0x42   : > { %p666_p7 = scmp.ne.s32.totalorder %s195_s5, %s665_s25  ;;  %s670_s26 = sshll.u32 %s754_s21, 4  ;;  %s671_s26 = int_to_ptr.vmem [resolvable:$false] %s670_s26 }
  0x43   : > { %s672_s27 = scalar_lea.vmem %s671_s26, 512  ;;  %p673_p13 = scmp.lt.s32.totalorder %s195_s5, %s671_s26 }
  0x44   : > { %p668_p9 = pnand %p666_p7, %p654_p0  ;;  %p674_p5 = scmp.lt.s32.totalorder %s672_s27, %s665_s25 }
  0x46   : > { %p669_p3 = pneg %p668_p9  ;;  %p675_p4 = por %p674_p5, %p673_p13 }
  0x48   : > { %p676_p8 = pnand %p675_p4, %p669_p3 }
  0x4a   : > { %679 = shalt.err (!%p676_p8)
}
  0x4b   : > { %549 = dma.hbm_to_vmem [thread:$0]  (!%p881_p11), %s879_s29, 256, %s195_s5, %s183_s7  }
  0x4c   : > { %p970_p10 = scmp.ne.s32.totalorder %s965_s24, 0 }
  0x4d   : > { %s902_s28 = sand.u32 (!%p970_p10), 1, %s740_s18   ;;  %p971_p0 = scmp.ne.s32.totalorder (!%p970_p10), %s963_s22, 0 }
  0x4e   : > { %203 = sbr.rel (%p970_p10) target bundleno = 334 (0x14e), region = 36  ;;  %s481_s30 = sshll.u32 (!%p970_p10), %s902_s28, 4 }
  0x4f   : > { %s206_s8 = scalar_lea.sflag (!%p970_p10), [#allocation4], %s902_s28  ;;  %s906_s9 = scalar_lea.vmem (!%p970_p10), [#allocation3], %s481_s30 }
  0x53   : > { %723 = dma.done.wait (%p971_p0), %s206_s8, 256  }
  0x54   : > { %725 = vsyncadd (%p971_p0), %s206_s8, 4294967040  ;;  %p972_p4 = scmp.eq.s32.totalorder %s805_s0, 0 }
  0x56   : > { %727 = dma.done.wait (%p972_p4), [#allocation7], 4224   ;;  %p973_p8 = pmov %p972_p4 }
  0x57   : > { %v275_v0 = vld [vmem:[#allocation6 + $0xf8] sm:$0xff]  ;;  %v274_v2 = vld [vmem:[#allocation6 + $0xf0] sm:$0xff]  ;;  %v273_v4 = vld [vmem:[#allocation6 + $0xe8] sm:$0xff]  ;;  %s276_s22 = sld [smem:[#allocation2]]  ;;  %v363_v42 = vlaneseq  ;;  %s484_s24 = sshll.u32 %s902_s28, 3 }
  0x58   : > { %729 = vsyncadd (%p973_p8), [#allocation7], 4294963072  ;;  %v259_v1 = vld [vmem:[#allocation6 + $0x78] sm:$0xff]  ;;  %492 = vmatprep.subr.mxu0 %v275_v0  ;;  %v258_v3 = vld [vmem:[#allocation6 + $0x70] sm:$0xff]  ;;  %s488_s29 = sshll.u32 %s805_s0, 7  ;;  %s241_s5 = scalar_lea.vmem [#allocation9], %s484_s24 }
  0x59   : > { %493 = vmatpush3.msra.mxu0 %v259_v1  ;;  %v257_v5 = vld [vmem:[#allocation6 + $0x68] sm:$0xff]  ;;  %v272_v6 = vld [vmem:[#allocation6 + $0xe0] sm:$0xff]  ;;  %v271_v8 = vld [vmem:[#allocation6 + $0xd8] sm:$0xff]  ;;  %v364_v43 = vshrl.u32 %v363_v42, 7  ;;  %s383_s6 = sshll.u32 %s241_s5, 4  ;;  %s381_s11 = scalar_lea.hbm %s958_s4, %s488_s29  ;;  %s384_s6 = int_to_ptr.vmem [resolvable:$true] %s383_s6 }
  0x5a   : > { %494 = vmatprep.subr.mxu0 %v274_v2  ;;  %v256_v7 = vld [vmem:[#allocation6 + $0x60] sm:$0xff]  ;;  %v255_v9 = vld [vmem:[#allocation6 + $0x58] sm:$0xff]  ;;  %v270_v10 = vld [vmem:[#allocation6 + $0xd0] sm:$0xff]  ;;  %s370_s13 = scalar_lea.sflag [#allocation5], %s902_s28  ;;  %s680_s14 = scalar_lea.vmem %s384_s6, 128 }
  0x5b   : > { %495 = vmatpush3.msra.mxu0 %v258_v3  ;;  %v254_v11 = vld [vmem:[#allocation6 + $0x50] sm:$0xff]  ;;  %v269_v12 = vld [vmem:[#allocation6 + $0xc8] sm:$0xff]  ;;  %v268_v15 = vld [vmem:[#allocation6 + $0xc0] sm:$0xff]  ;;  %v365_v44 = vsub.s32 0, %v364_v43  ;;  %p681_p3 = scmp.ne.s32.totalorder %s384_s6, %s680_s14  ;;  %p974_p11 = scmp.ne.s32.totalorder %s968_s15, 0 }
  0x5c   : > { %496 = vmatprep.subr.mxu0 %v273_v4  ;;  %v243_v13 = vld [vmem:[%s906_s9 + $0x8] sm:$0xff]  ;;  %v252_v16 = vld [vmem:[#allocation6 + $0x40] sm:$0xff]  ;;  %v266_v19 = vld [vmem:[#allocation6 + $0xb0] sm:$0xff]  ;;  %s755_s25 = smov [#allocation9]  }
  0x5d   : > { %497 = vmatpush3.msra.mxu0 %v257_v5  ;;  %v253_v14 = vld [vmem:[#allocation6 + $0x48] sm:$0xff]  ;;  %357 = vmatprep.mubr.f32.mxu0 %v243_v13  ;;  %v267_v17 = vld [vmem:[#allocation6 + $0xb8] sm:$0xff]  ;;  %v250_v20 = vld [vmem:[#allocation6 + $0x30] sm:$0xff]  ;;  %v280_v35 = vstv %s276_s22  ;;  %p682_p1 = pnand %p681_p3, %p974_p11  ;;  %s684_s21 = sshll.u32 %s755_s25, 4  ;;  %s685_s21 = int_to_ptr.vmem [resolvable:$false] %s684_s21 }
  0x5e   : > { %498 = vmatprep.subr.mxu0 %v272_v6  ;;  %v251_v18 = vld [vmem:[#allocation6 + $0x38] sm:$0xff]  ;;  %v265_v21 = vld [vmem:[#allocation6 + $0xa8] sm:$0xff]  ;;  %v264_v23 = vld [vmem:[#allocation6 + $0xa0] sm:$0xff]  ;;  %s686_s0 = scalar_lea.vmem %s685_s21, 256  ;;  %p687_p6 = scmp.lt.s32.totalorder %s384_s6, %s685_s21 }
  0x5f   : > { %499 = vmatpush3.msra.mxu0 %v256_v7  ;;  %v249_v22 = vld [vmem:[#allocation6 + $0x28] sm:$0xff]  ;;  %v248_v24 = vld [vmem:[#allocation6 + $0x20] sm:$0xff]  ;;  %v263_v25 = vld [vmem:[#allocation6 + $0x98] sm:$0xff]  ;;  %p683_p2 = pneg %p682_p1  ;;  %p688_p12 = scmp.lt.s32.totalorder %s686_s0, %s680_s14 }
  0x60   : > { %500 = vmatprep.subr.mxu0 %v271_v8  ;;  %v247_v26 = vld [vmem:[#allocation6 + $0x18] sm:$0xff]  ;;  %v262_v27 = vld [vmem:[#allocation6 + $0x90] sm:$0xff]  ;;  %v261_v29 = vld [vmem:[#allocation6 + $0x88] sm:$0xff] }
  0x61   : > { %501 = vmatpush3.msra.mxu0 %v255_v9  ;;  %v246_v28 = vld [vmem:[#allocation6 + $0x10] sm:$0xff]  ;;  %v245_v30 = vld [vmem:[#allocation6 + $0x8] sm:$0xff]  ;;  %v260_v31 = vld [vmem:[#allocation6 + $0x80] sm:$0xff]  ;;  %p689_p7 = por %p688_p12, %p687_p6 }
  0x62   : > { %502 = vmatprep.subr.mxu0 %v270_v10  ;;  %v244_v32 = vld [vmem:[#allocation6] sm:$0xff] }
  0x63   : > { %503 = vmatpush3.msra.mxu0 %v254_v11  ;;  %v242_v33 = vld [vmem:[%s906_s9] sm:$0xff]  ;;  %p690_p9 = pnand %p689_p7, %p683_p2 }
  0x64   : > { %504 = vmatprep.subr.mxu0 %v269_v12  ;;  %v278_v34 = vld [vmem:[#allocation8 + $0x1] sm:$0x1]  ;;  %v279_v37 = vld [vmem:[#allocation8 + $0x2] sm:$0x1]  ;;  %v486_v47 = vld [vmem:[#allocation8] ss:$0 sm:$0xff] }
  0x65   : > { %505 = vmatpush3.msra.mxu0 %v253_v14  ;;  %v281_v36 = vmul.f32 %v280_v35, %v278_v34 }
  0x66   : > { %506 = vmatprep.subr.mxu0 %v268_v15 }
  0x67   : > { %507 = vmatpush3.msra.mxu0 %v252_v16  ;;  %v282_v38 = vadd.f32 %v281_v36, %v279_v37 }
  0x68   : > { %508 = vmatprep.subr.mxu0 %v267_v17 }
  0x69   : > { %509 = vmatpush3.msra.mxu0 %v251_v18  ;;  %v485_v39 = vmul.f32 -1.442695, %v282_v38 }
  0x6a   : > { %510 = vmatprep.subr.mxu0 %v266_v19 }
  0x6b   : > { %511 = vmatpush3.msra.mxu0 %v250_v20  ;;  %596 = vpow2.f32 %v485_v39 }
  0x6c   : > { %512 = vmatprep.subr.mxu0 %v265_v21 }
  0x6d   : > { %513 = vmatpush3.msra.mxu0 %v249_v22 }
  0x6e   : > { %514 = vmatprep.subr.mxu0 %v264_v23 }
  0x6f   : > { %515 = vmatpush3.msra.mxu0 %v248_v24 }
  0x70   : > { %516 = vmatprep.subr.mxu0 %v263_v25 }
  0x71   : > { %517 = vmatpush3.msra.mxu0 %v247_v26 }
  0x72   : > { %518 = vmatprep.subr.mxu0 %v262_v27 }
  0x73   : > { %519 = vmatpush3.msra.mxu0 %v246_v28 }
  0x74   : > { %520 = vmatprep.subr.mxu0 %v261_v29 }
  0x75   : > { %521 = vmatpush3.msra.mxu0 %v245_v30 }
  0x76   : > { %522 = vmatprep.subr.mxu0 %v260_v31 }
  0x77   : > { %523 = vmatpush3.msra.mxu0 %v244_v32 }
  0x78   : > { %358 = vmatmul.mubr.f32.vlgmr.msra.gmra.mxu0 %v242_v33  ;;  %v597_v40 = vpop.eup %596 }
  0x79   : > { %v286_v41 = vadd.f32 1.0, %v597_v40 }
  0x7b   : > { %598 = vrcp.f32 %v286_v41 }
  0x88   : > { %v599_v45 = vpop.eup %598 }
  0x89   : > { %v366_v50 = vrot.slane %v599_v45, %v365_v44 }
 0x138   : > { %v524_v46 = vpop.f32.mrf.mxu0 }
 0x13a   : > { %v525_v48 = vpop.f32.mrf.mxu0 }
 0x13b   : > { %v526_v49 = vadd.f32 %v525_v48, %v524_v46 }
 0x13d   : > { %v360_v51 = vadd.f32 %v526_v49, %v486_v47 }
 0x13f   : > { %v367_v52 = vmul.f32 %v366_v50, %v360_v51 }
 0x141   : > { %368 = vst [vmem:[%s241_s5] sm:$0xff] %v367_v52 }
 0x142   : > { %693 = shalt.err (!%p690_p9)
}
 0x143   : > { %s694_s26 = scalar_lea.hbm %s381_s11, 128  ;;  %s698_s30 = scalar_lea.hbm %s958_s4, 256 }
 0x144   : > { %p695_p13 = scmp.ne.s32.totalorder %s381_s11, %s694_s26  ;;  %p699_p0 = scmp.lt.s32.totalorder %s381_s11, %s958_s4 }
 0x145   : > { %p700_p4 = scmp.lt.s32.totalorder %s698_s30, %s694_s26 }
 0x146   : > { %p696_p5 = pnand %p695_p13, %p974_p11 }
 0x147   : > { %p701_p8 = por %p700_p4, %p699_p0 }
 0x148   : > { %p697_p10 = pneg %p696_p5 }
 0x14a   : > { %p702_p3 = pnand %p701_p8, %p697_p10 }
 0x14c   : > { %705 = shalt.err (!%p702_p3)
}
 0x14d   : > { %537 = dma.vmem_to_hbm [thread:$0]  (%p974_p11), %s384_s6, 128, %s381_s11, %s370_s13  }
 0x14e PF: > { %s395_s22 = sand.u32 1, %s736_s17   ;;  %p975_p1 = scmp.ne.s32.totalorder %s964_s23, 0 }
 0x14f   : > { %p976_p2 = scmp.ge.s32.totalorder %s748_s20, 2  ;;  %s396_s24 = scalar_lea.sflag [#allocation5], %s395_s22 }
 0x151   : > { %p551_p6 = pnand %p976_p2, %p975_p1 }
 0x153   : > { %p552_p12 = pneg %p551_p6 }
 0x155   : > { %731 = dma.done.wait (%p552_p12), %s396_s24, 128  }
 0x156   : > { %733 = vsyncadd (%p552_p12), %s396_s24, 4294967168  ;;  %p19_p7 = scmp.ge.s32.totalorder %s856_s12, 4   ;;  %s977_s17 = smov %s740_s18 }
 0x157   : > { %s978_s18 = smov %s744_s19  ;;  %s979_s19 = smov %s872_s16 }
 0x158   : > { %s980_s20 = smov %s856_s12  ;;  %21 = sbr.rel (!%p19_p7) target bundleno = 8 (0x8), region = 89 }
 0x15d   :  { %401 = vsyncpa [#allocation4], 1 }
 0x15e   :  { %403 = vsyncpa [#allocation4 + $0x1], 1 }
 0x15f   :  { %404 = vsyncpa [#allocation7], 1 }
 0x160   :  { %405 = vsyncpa [#allocation5], 1 }
 0x161   :  { %407 = vsyncpa [#allocation5 + $0x1], 1 }

</bundles_post_ra>
